<compile_context>
chip_gen: v7x
topology: tpu7x:2x2x1
jax: 0.10.0
libtpu: 0.0.40
codegen_flags: <defaults>
</compile_context>

<pallas_src>
import jax
import jax.numpy as jnp
from jax import lax
from jax.experimental import pallas as pl
from jax.experimental.pallas import tpu as pltpu

_LANE = 128
_MAX_TILE_LANES = 8192  # ~1 MiB/step of double-buffered blocks: safe on v5e/v6e/v7x


def _stats_kernel(x_ref, g_ref, s_ref, g_acc, s_acc):
    """Accumulate Gram = sum_m relu(x)_m relu(x)_m^T (C_in,C_in) and
    s = sum_m relu(x)_m (C_in,1) over the lane (M) axis.
    Leading grid axis p produces independent per-core partials (megacore-safe)."""
    j = pl.program_id(1)

    @pl.when(j == 0)
    def _():
        g_acc[...] = jnp.zeros_like(g_acc)
        s_acc[...] = jnp.zeros_like(s_acc)

    xr = jnp.maximum(x_ref[...], 0.0)                           # (C_in, tm)
    # Contract over the lane axis of both operands: xr @ xr^T on the MXU.
    g_acc[...] += lax.dot_general(
        xr, xr, dimension_numbers=(((1,), (1,)), ((), ())),
        preferred_element_type=jnp.float32)                     # (C_in, C_in)
    s_acc[...] += jnp.sum(xr, axis=1, keepdims=True)            # (C_in, 1)

    @pl.when(j == pl.num_programs(1) - 1)
    def _():
        g_ref[0] = g_acc[...]
        s_ref[0] = s_acc[...]


def _conv_bn_kernel(x_ref, w_ref, scale_ref, shift_ref, o_ref):
    """out = (W @ relu(x)) * scale + shift for one lane tile.
    scale/shift fold the BatchNorm batch statistics and affine params."""
    xr = jnp.maximum(x_ref[...], 0.0)                           # (C_in, tm)
    y = jnp.dot(w_ref[...], xr, preferred_element_type=jnp.float32)  # (C_out, tm)
    o_ref[...] = y * scale_ref[...] + shift_ref[...]


def conv_block_forward(x_nchw, conv_w, conv_b, bn_gamma, bn_beta, eps=1e-5):
    """x_nchw: (N, C_in, H, W) float32. conv_w: (C_out, C_in, 1, 1).
    Returns the same output as ConvBlock.forward in training mode.
    Note: conv_b is accepted for interface fidelity but unused — a constant
    per-channel bias cancels exactly inside training-mode BatchNorm."""
    del conv_b
    N, C_in, H, W = x_nchw.shape
    C_out = conv_w.shape[0]
    M = N * H * W

    # ---- glue: NCHW -> lane-dense (C, M); weight -> (C_out, C_in) ----
    x2d = jnp.transpose(x_nchw.astype(jnp.float32), (1, 0, 2, 3)).reshape(C_in, M)
    w2d = conv_w.reshape(C_out, C_in).astype(jnp.float32)

    # ---- tiling along M (lanes); zero-pad the tail (relu(0)=0 keeps stats exact) ----
    tm = min(_MAX_TILE_LANES, pl.cdiv(M, _LANE) * _LANE)
    M_pad = pl.cdiv(M, tm) * tm
    if M_pad != M:
        x2d = jnp.pad(x2d, ((0, 0), (0, M_pad - M)))
    n_tiles = M_pad // tm
    n_par = 2 if n_tiles % 2 == 0 else 1        # split stats sweep across 2 TCs (v7x)
    tiles_per_core = n_tiles // n_par

    # ---- pass 1: relu + Gram / sum statistics (reads x once, tiny outputs) ----
    g_part, s_part = pl.pallas_call(
        _stats_kernel,
        out_shape=(
            jax.ShapeDtypeStruct((n_par, C_in, C_in), jnp.float32),
            jax.ShapeDtypeStruct((n_par, C_in, 1), jnp.float32),
        ),
        grid_spec=pltpu.PrefetchScalarGridSpec(
            num_scalar_prefetch=0,
            grid=(n_par, tiles_per_core),
            in_specs=[
                pl.BlockSpec((C_in, tm),
                             lambda p, j: (0, p * tiles_per_core + j)),
            ],
            out_specs=[
                pl.BlockSpec((1, C_in, C_in), lambda p, j: (p, 0, 0)),
                pl.BlockSpec((1, C_in, 1), lambda p, j: (p, 0, 0)),
            ],
            scratch_shapes=[
                pltpu.VMEM((C_in, C_in), jnp.float32),
                pltpu.VMEM((C_in, 1), jnp.float32),
            ],
        ),
        compiler_params=pltpu.CompilerParams(
            dimension_semantics=("parallel", "arbitrary")),
    )(x2d)

    # ---- fold batch stats + BN affine into per-channel scale/shift (tiny XLA ops) ----
    g = jnp.sum(g_part, axis=0)                                  # (C_in, C_in)
    s = jnp.sum(s_part, axis=0)                                  # (C_in, 1)
    inv_m = jnp.float32(1.0 / M)
    mean = (w2d @ s) * inv_m                                     # (C_out, 1)  (bias-free)
    ey2 = jnp.sum((w2d @ g) * w2d, axis=1, keepdims=True) * inv_m  # diag(W G W^T)/M
    var = jnp.maximum(ey2 - mean * mean, 0.0)                    # biased batch variance
    scale = bn_gamma.reshape(C_out, 1).astype(jnp.float32) * lax.rsqrt(var + jnp.float32(eps))
    shift = bn_beta.reshape(C_out, 1).astype(jnp.float32) - mean * scale

    # ---- pass 2: fused relu + 1x1 conv + BN affine, lane-dense output ----
    o2d = pl.pallas_call(
        _conv_bn_kernel,
        out_shape=jax.ShapeDtypeStruct((C_out, M_pad), jnp.float32),
        grid_spec=pltpu.PrefetchScalarGridSpec(
            num_scalar_prefetch=0,
            grid=(n_tiles,),
            in_specs=[
                pl.BlockSpec((C_in, tm), lambda i: (0, i)),
                pl.BlockSpec((C_out, C_in), lambda i: (0, 0)),
                pl.BlockSpec((C_out, 1), lambda i: (0, 0)),
                pl.BlockSpec((C_out, 1), lambda i: (0, 0)),
            ],
            out_specs=pl.BlockSpec((C_out, tm), lambda i: (0, i)),
        ),
        compiler_params=pltpu.CompilerParams(
            dimension_semantics=("parallel",)),
    )(x2d, w2d, scale, shift)

    # ---- glue: (C_out, M) -> NCHW ----
    o2d = o2d[:, :M]
    return jnp.transpose(o2d.reshape(C_out, N, H, W), (1, 0, 2, 3))


def _reference(x_nchw, conv_w, conv_b, bn_gamma, bn_beta, eps=1e-5):
    """Pure-JAX reference matching the PyTorch forward (training-mode BN)."""
    x = jnp.maximum(x_nchw, 0.0)
    y = jnp.einsum("nchw,oc->nohw", x, conv_w.reshape(conv_w.shape[0], -1))
    y = y + conv_b[None, :, None, None]
    mean = jnp.mean(y, axis=(0, 2, 3), keepdims=True)
    var = jnp.mean((y - mean) ** 2, axis=(0, 2, 3), keepdims=True)
    yhat = (y - mean) / jnp.sqrt(var + eps)
    return yhat * bn_gamma[None, :, None, None] + bn_beta[None, :, None, None]


if __name__ == "__main__":
    key = jax.random.PRNGKey(0)
    N, C_in, H, W = 2, 4, 16, 16
    C_out, ksize = 8, 1

    k_x, k_w, k_b = jax.random.split(key, 3)
    x = jax.random.normal(k_x, (N, C_in, H, W), dtype=jnp.float32)

    # Deterministic parameter init (shapes per nn.Conv2d / nn.BatchNorm2d).
    fan_in = C_in * ksize * ksize
    bound = 1.0 / (fan_in ** 0.5)
    conv_w = jax.random.uniform(k_w, (C_out, C_in, ksize, ksize),
                                minval=-bound, maxval=bound, dtype=jnp.float32)
    conv_b = jax.random.uniform(k_b, (C_out,),
                                minval=-bound, maxval=bound, dtype=jnp.float32)
    bn_gamma = jnp.ones((C_out,), jnp.float32)   # BatchNorm2d default init
    bn_beta = jnp.zeros((C_out,), jnp.float32)

    out = conv_block_forward(x, conv_w, conv_b, bn_gamma, bn_beta)
    out = jax.block_until_ready(out)

    ref = _reference(x, conv_w, conv_b, bn_gamma, bn_beta)
    assert out.shape == (N, C_out, H, W)
    assert jnp.allclose(out, ref, atol=1e-4, rtol=1e-4), \
        float(jnp.max(jnp.abs(out - ref)))

    print("KERNEL_OK")
</pallas_src>

<mosaic_0001>
module attributes {stable_mosaic.version = 11 : i64} {
  func.func @_stats_kernel(%arg0: i32, %arg1: i32, %arg2: memref<4x512xf32, #tpu.memory_space<vmem>>, %arg3: memref<1x4x4xf32, #tpu.memory_space<vmem>>, %arg4: memref<1x4x1xf32, #tpu.memory_space<vmem>>, %arg5: memref<4x4xf32, #tpu.memory_space<vmem>>, %arg6: memref<4x1xf32, #tpu.memory_space<vmem>>) attributes {dimension_semantics = [#tpu.dimension_semantics<parallel>, #tpu.dimension_semantics<arbitrary>], iteration_bounds = array<i64: 1, 1>, scalar_prefetch = 0 : i64, scratch_operands = 2 : i64, tpu.core_type = #tpu.core_type<tc>, window_params = [{transform_indices = @transform_0, window_bounds = array<i64: 4, 512>}, {transform_indices = @transform_1, window_bounds = array<i64: 1, 4, 4>}, {transform_indices = @transform_2, window_bounds = array<i64: 1, 4, 1>}]} {
    %c0_i32 = arith.constant 0 : i32
    %0 = arith.cmpi eq, %arg1, %c0_i32 : i32
    %1 = arith.extui %0 : i1 to i32
    %c0_i32_0 = arith.constant 0 : i32
    %2 = arith.cmpi ne, %1, %c0_i32_0 : i32
    scf.if %2 {
      %cst_14 = arith.constant 0.000000e+00 : f32
      %18 = vector.broadcast %cst_14 : f32 to vector<4x4xf32>
      %c0_15 = arith.constant 0 : index
      %c0_16 = arith.constant 0 : index
      %19 = vector.load %arg5[%c0_15, %c0_16] : memref<4x4xf32, #tpu.memory_space<vmem>>, vector<4x4xf32>
      tpu.vector_store %arg5[%c0_15, %c0_16], %18 {strides = array<i32>} : memref<4x4xf32, #tpu.memory_space<vmem>>, vector<4x4xf32>,
      %cst_17 = arith.constant 0.000000e+00 : f32
      %20 = vector.broadcast %cst_17 : f32 to vector<4x1xf32>
      %c0_18 = arith.constant 0 : index
      %c0_19 = arith.constant 0 : index
      %21 = vector.load %arg6[%c0_18, %c0_19] : memref<4x1xf32, #tpu.memory_space<vmem>>, vector<4x1xf32>
      tpu.vector_store %arg6[%c0_18, %c0_19], %20 {strides = array<i32>} : memref<4x1xf32, #tpu.memory_space<vmem>>, vector<4x1xf32>,
    } else {
    }
    %c0 = arith.constant 0 : index
    %c0_1 = arith.constant 0 : index
    %3 = vector.load %arg2[%c0, %c0_1] : memref<4x512xf32, #tpu.memory_space<vmem>>, vector<4x512xf32>
    %cst = arith.constant 0.000000e+00 : f32
    %4 = vector.broadcast %cst : f32 to vector<4x512xf32>
    %5 = arith.maximumf %3, %4 : vector<4x512xf32>
    %c0_2 = arith.constant 0 : index
    %c0_3 = arith.constant 0 : index
    %6 = vector.load %arg5[%c0_2, %c0_3] : memref<4x4xf32, #tpu.memory_space<vmem>>, vector<4x4xf32>
    %cst_4 = arith.constant dense<0.000000e+00> : vector<4x4xf32>
    %7 = tpu.matmul %5, %5, %cst_4 {dimension_numbers = #tpu.dot_dimension_numbers<[1], [1], [0], [0], [0, 0, 1, 0], [], []>} : vector<4x512xf32>, vector<4x512xf32>, vector<4x4xf32> -> vector<4x4xf32>
    %8 = arith.addf %6, %7 : vector<4x4xf32>
    %c0_5 = arith.constant 0 : index
    %c0_6 = arith.constant 0 : index
    %9 = vector.load %arg5[%c0_5, %c0_6] : memref<4x4xf32, #tpu.memory_space<vmem>>, vector<4x4xf32>
    tpu.vector_store %arg5[%c0_5, %c0_6], %8 {strides = array<i32>} : memref<4x4xf32, #tpu.memory_space<vmem>>, vector<4x4xf32>,
    %c0_7 = arith.constant 0 : index
    %c0_8 = arith.constant 0 : index
    %10 = vector.load %arg6[%c0_7, %c0_8] : memref<4x1xf32, #tpu.memory_space<vmem>>, vector<4x1xf32>
    %cst_9 = arith.constant dense<0.000000e+00> : vector<4xf32>
    %11 = vector.multi_reduction <add>, %5, %cst_9 [1] : vector<4x512xf32> to vector<4xf32>
    %12 = vector.shape_cast %11 : vector<4xf32> to vector<4x1xf32>
    %13 = arith.addf %10, %12 : vector<4x1xf32>
    %c0_10 = arith.constant 0 : index
    %c0_11 = arith.constant 0 : index
    %14 = vector.load %arg6[%c0_10, %c0_11] : memref<4x1xf32, #tpu.memory_space<vmem>>, vector<4x1xf32>
    tpu.vector_store %arg6[%c0_10, %c0_11], %13 {strides = array<i32>} : memref<4x1xf32, #tpu.memory_space<vmem>>, vector<4x1xf32>,
    %c0_i32_12 = arith.constant 0 : i32
    %15 = arith.cmpi eq, %arg1, %c0_i32_12 : i32
    %16 = arith.extui %15 : i1 to i32
    %c0_i32_13 = arith.constant 0 : i32
    %17 = arith.cmpi ne, %16, %c0_i32_13 : i32
    scf.if %17 {
      %c0_14 = arith.constant 0 : index
      %c0_15 = arith.constant 0 : index
      %18 = vector.load %arg5[%c0_14, %c0_15] : memref<4x4xf32, #tpu.memory_space<vmem>>, vector<4x4xf32>
      %c0_16 = arith.constant 0 : index
      %c0_17 = arith.constant 0 : index
      %c0_18 = arith.constant 0 : index
      %19 = vector.load %arg3[%c0_16, %c0_17, %c0_18] : memref<1x4x4xf32, #tpu.memory_space<vmem>>, vector<1x4x4xf32>
      %20 = vector.shape_cast %19 : vector<1x4x4xf32> to vector<4x4xf32>
      %21 = vector.shape_cast %18 : vector<4x4xf32> to vector<1x4x4xf32>
      tpu.vector_store %arg3[%c0_16, %c0_17, %c0_18], %21 {strides = array<i32>} : memref<1x4x4xf32, #tpu.memory_space<vmem>>, vector<1x4x4xf32>,
      %c0_19 = arith.constant 0 : index
      %c0_20 = arith.constant 0 : index
      %22 = vector.load %arg6[%c0_19, %c0_20] : memref<4x1xf32, #tpu.memory_space<vmem>>, vector<4x1xf32>
      %c0_21 = arith.constant 0 : index
      %c0_22 = arith.constant 0 : index
      %c0_23 = arith.constant 0 : index
      %23 = vector.load %arg4[%c0_21, %c0_22, %c0_23] : memref<1x4x1xf32, #tpu.memory_space<vmem>>, vector<1x4x1xf32>
      %24 = vector.shape_cast %23 : vector<1x4x1xf32> to vector<4x1xf32>
      %25 = vector.shape_cast %22 : vector<4x1xf32> to vector<1x4x1xf32>
      tpu.vector_store %arg4[%c0_21, %c0_22, %c0_23], %25 {strides = array<i32>} : memref<1x4x1xf32, #tpu.memory_space<vmem>>, vector<1x4x1xf32>,
    } else {
    }
    return
  }
  func.func @transform_0(%arg0: i32, %arg1: i32) -> (i32, i32) {
    %c1_i32 = arith.constant 1 : i32
    %0 = arith.muli %arg0, %c1_i32 : i32
    %1 = arith.addi %0, %arg1 : i32
    %c0_i32 = arith.constant 0 : i32
    %c0_i32_0 = arith.constant 0 : i32
    return %c0_i32, %1 : i32, i32
  }
  func.func @transform_1(%arg0: i32, %arg1: i32) -> (i32, i32, i32) {
    %c0_i32 = arith.constant 0 : i32
    %c0_i32_0 = arith.constant 0 : i32
    %c0_i32_1 = arith.constant 0 : i32
    return %arg0, %c0_i32, %c0_i32_0 : i32, i32, i32
  }
  func.func @transform_2(%arg0: i32, %arg1: i32) -> (i32, i32, i32) {
    %c0_i32 = arith.constant 0 : i32
    %c0_i32_0 = arith.constant 0 : i32
    %c0_i32_1 = arith.constant 0 : i32
    return %arg0, %c0_i32, %c0_i32_0 : i32, i32, i32
  }
}

</mosaic_0001>

<bundles_post_ra>
// kernel: tpu_custom_call.1
= control target key start
LH: loop header
LB: loop body
LE: loop exit
PB: predicated region body
PF: predicated region fallthrough
CT: control target
= control target key end

     0   :  { %8 = vsyncpa [#allocation5], 0  ;;  %s330_s0 = inlined_call_operand.hbm [shape: f32[4,512], index: 0, kind: input, shape index: {}]   ;;  %s331_s1 = inlined_call_operand.hbm [shape: f32[1,4,4], index: 1, kind: output, shape index: {0}]   ;;  %s332_s2 = inlined_call_operand.vmem [shape: f32[1,4,1], index: 2, kind: output, shape index: {1}]  }
   0x1   :  { %9 = vsyncpa [#allocation6], 0  ;;  %s282_s9 = smov [#allocation4]   ;;  %s234_s13 = scalar_lea.hbm %s330_s0, 256 }
   0x2   :  { %s20_s10 = sshll.u32 %s282_s9, 4  ;;  %p235_p0 = scmp.ne.s32.totalorder %s330_s0, %s234_s13  ;;  %s21_s10 = int_to_ptr.vmem [resolvable:$true] %s20_s10 }
   0x3   :  { %p238_p1 = scmp.lt.u32.totalorder %s234_s13, %s330_s0 }
   0x5   :  { %p240_p2 = pnand %p238_p1, %p235_p0 }
   0x7   :  { %243 = shalt.err (!%p240_p2)
}
   0x8   :  { %s244_s18 = scalar_lea.vmem %s21_s10, 256  ;;  %p249_p4 = scmp.lt.s32.totalorder %s21_s10, %s21_s10 }
   0x9   :  { %p245_p3 = scmp.ne.s32.totalorder %s21_s10, %s244_s18  ;;  %p250_p5 = scmp.lt.s32.totalorder %s244_s18, %s244_s18 }
   0xb   :  { %p251_p6 = por %p250_p5, %p249_p4 }
   0xd   :  { %p252_p7 = pnand %p251_p6, %p245_p3 }
   0xf   :  { %255 = shalt.err (!%p252_p7)
}
  0x10   :  { %23 = dma.hbm_to_vmem [thread:$0]  %s330_s0, 256, %s21_s10, [#allocation5]  }
  0x11   :  { %278 = dma.done.wait [#allocation5], 256  }
  0x12   :  { %279 = vsyncadd [#allocation5], 4294967040  ;;  %v37_v0 = vld [vmem:[#allocation4] sm:$0xff]  ;;  %v38_v1 = vld [vmem:[#allocation4 + $0x8] sm:$0xff]  ;;  %vm192_vm0 = vcmask 1043456   ;;  %vm33_vm1 = vcmask 27648  }
  0x13   :  { %v39_v2 = vmax.f32 %v37_v0, 0.0  ;;  %v40_v3 = vmax.f32 %v38_v1, 0.0  ;;  %v283_v13 = vmov 0.0   ;;  %vm35_vm2 = vcmask 3072   ;;  %s284_s22 = smov [#allocation7]  }
  0x14   :  { %34 = vst.msk [vmem:[#allocation2] sm:$0xf] %vm33_vm1, %v283_v13  ;;  %s218_s23 = sshll.u32 %s284_s22, 4  ;;  %s219_s23 = int_to_ptr.vmem [resolvable:$true] %s218_s23 }
  0x15   :  { %v44_v4 = vcombine.high %v39_v2, %v39_v2  ;;  %v45_v5 = vcombine.high %v40_v3, %v40_v3  ;;  %v193_v6 = vsel %vm192_vm0, %v39_v2, 0.0  ;;  %v196_v8 = vsel %vm192_vm0, %v40_v3, 0.0  ;;  %36 = vst.msk [vmem:[#allocation3] sm:$0xf] %vm35_vm2, %v283_v13  ;;  %s256_s24 = scalar_lea.vmem %s219_s23, 64  ;;  %p261_p9 = scmp.lt.s32.totalorder %s219_s23, %s219_s23 }
  0x16   :  { %p257_p8 = scmp.ne.s32.totalorder %s219_s23, %s256_s24  ;;  %p262_p10 = scmp.lt.s32.totalorder %s256_s24, %s256_s24 }
  0x17   :  { %48 = vmatprep.subr.mxu0 %v44_v4  ;;  %118 = vmatprep.subr.mxu1 %v45_v5  ;;  %v194_v7 = vsel %vm192_vm0, %v44_v4, 0.0  ;;  %v198_v10 = vsel %vm192_vm0, %v45_v5, 0.0 }
  0x18   :  { %49 = vmatpush1.xpose.msra.mxu0 %v39_v2  ;;  %119 = vmatpush1.xpose.msra.mxu1 %v40_v3  ;;  %v195_v9 = vadd.f32 %v194_v7, %v193_v6  ;;  %p263_p11 = por %p262_p10, %p261_p9 }
  0x19   :  { %112 = vmatprep.mubr.f32.mxu0 %v44_v4  ;;  %182 = vmatprep.mubr.f32.mxu1 %v45_v5 }
  0x1a   :  { %v197_v11 = vadd.f32 %v196_v8, %v195_v9  ;;  %p264_p12 = pnand %p263_p11, %p257_p8 }
  0x1b   :  { %113 = vmatmul.mubr.f32.vlgmr.msra.gmra.mrb[0].mxu0 %v39_v2  ;;  %183 = vmatmul.mubr.f32.vlgmr.msra.gmra.mrb[0].mxu1 %v40_v3  ;;  %v41_v19 = vld [vmem:[#allocation2] sm:$0xf] }
  0x1c   :  { %v199_v12 = vadd.f32 %v198_v10, %v197_v11  ;;  %v191_v14 = vld [vmem:[#allocation3] sm:$0xf] }
  0x1e   :  { %200 = vadd.xlane.f32.xlu0 %v199_v12 }
  0xab   :  { %v201_v15 = vpop.xlane.xlu0 %200 }
  0xac   :  { %v202_v16 = vadd.f32 %v201_v15, %v191_v14 }
  0xae   :  { %204 = vst.msk [vmem:[#allocation3] sm:$0xf] %vm35_vm2, %v202_v16 }
  0xb5   :  { %v210_v17 = vld [vmem:[#allocation3] sm:$0xf] }
  0xb6   :  { %211 = vst.msk [vmem:[%s332_s2] sm:$0xf] %vm35_vm2, %v210_v17 }
  0xee   :  { %v114_v18 = vpop.f32.mrb[0].mxu0  ;;  %v184_v20 = vpop.f32.mrb[0].mxu1 }
  0xef   :  { %v185_v21 = vadd.f32 %v184_v20, %v114_v18  ;;  %v116_v22 = vpop.f32.mrb[1].mxu0  ;;  %v186_v23 = vpop.f32.mrb[1].mxu1 }
  0xf1   :  { %v188_v24 = vadd.f32 %v185_v21, %v41_v19 }
  0xf3   :  { %190 = vst.msk [vmem:[#allocation2] sm:$0xf] %vm33_vm1, %v188_v24 }
  0xfa   :  { %v208_v25 = vld [vmem:[#allocation2] sm:$0xf] }
  0xfb   :  { %209 = vst.msk [vmem:[#allocation7] sm:$0xf] %vm33_vm1, %v208_v25 }
  0xfc   :  { %267 = shalt.err (!%p264_p12)
}
  0xfd   :  { %s268_s26 = scalar_lea.hbm %s331_s1, 64 }
  0xfe   :  { %p269_p13 = scmp.ne.s32.totalorder %s331_s1, %s268_s26  ;;  %p272_p0 = scmp.lt.u32.totalorder %s268_s26, %s331_s1 }
 0x100   :  { %p274_p1 = pnand %p272_p0, %p269_p13 }
 0x102   :  { %277 = shalt.err (!%p274_p1)
}
 0x103   :  { %221 = dma.vmem_to_hbm [thread:$0]  %s219_s23, 64, %s331_s1, [#allocation6]  }
 0x104   :  { %280 = dma.done.wait [#allocation6], 64  }
 0x105   :  { %281 = vsyncadd [#allocation6], 4294967232 }
 0x106   :  { %229 = vsyncpa [#allocation5], 1 }
 0x107   :  { %230 = vsyncpa [#allocation6], 1 }

</bundles_post_ra>
